<compile_context>
chip_gen: v6e
topology: v6e:2x2x1
jax: 0.10.0
libtpu: 0.0.40
codegen_flags: <defaults>
</compile_context>

<pallas_src>
import functools

import jax
import jax.numpy as jnp
from jax import lax
from jax.experimental import pallas as pl
from jax.experimental.pallas import tpu as pltpu


def _round_up(x, m):
    return ((x + m - 1) // m) * m


def _elastic_attn_kernel(q_ref, k_ref, o_ref, m_ref, l_ref, qs_ref, *maybe_acc,
                         attn_strategy, softmax_strategy, t_actual, tk,
                         t_has_pad, acc_in_out):
    acc_ref = o_ref if acc_in_out else maybe_acc[0]
    j = pl.program_id(1)
    last_j = pl.num_programs(1) - 1

    @pl.when(j == 0)
    def _init():
        # f32 cast + (optional) cosine row-normalization of q is done ONCE per
        # q-tile and cached in VMEM -- not redone for every T step.
        q = q_ref[...].astype(jnp.float32)
        if attn_strategy == "cos":
            q = q * lax.rsqrt(jnp.sum(q * q, axis=1, keepdims=True))
        qs_ref[...] = q
        acc_ref[...] = jnp.zeros_like(acc_ref)
        if softmax_strategy == "norm":
            m_ref[...] = jnp.full_like(m_ref, -jnp.inf)
            l_ref[...] = jnp.zeros_like(l_ref)

    q_s = qs_ref[...]                       # [tq, D] f32 (pre-normalized)
    k = k_ref[...]                          # [tk, D]  same tile is K and V
    k32 = k.astype(jnp.float32)

    if attn_strategy == "cos":
        # TODO(synk): traj row inverse-norms could be precomputed once (tiny
        # [T] side input) if a bundle dump shows the VALU slot is binding.
        k_s = k32 * lax.rsqrt(jnp.sum(k32 * k32, axis=1, keepdims=True))
    else:
        k_s = k32

    # score = q_s @ k_s^T, contracting on D (no explicit transpose / XLU).
    score = lax.dot_general(
        q_s, k_s,
        dimension_numbers=(((1,), (1,)), ((), ())),
        preferred_element_type=jnp.float32)          # [tq, tk]

    if t_has_pad:
        # Mask T-tail columns that were zero-padded in the wrapper.
        col = j * tk + lax.broadcasted_iota(jnp.int32, score.shape, 1)
        pad_val = -jnp.inf if softmax_strategy == "norm" else 0.0
        score = jnp.where(col < t_actual, score, pad_val)

    if softmax_strategy == "norm":
        # Online (flash-style) softmax over the T axis.
        m_prev = m_ref[...]
        m_new = jnp.maximum(m_prev, jnp.max(score, axis=1, keepdims=True))
        alpha = jnp.exp(m_prev - m_new)
        # TODO(synk): on v6e/v7x a bf16 EUP exp would halve the exp cost;
        # kept in f32 here for v5e portability and f32-reference parity.
        p = jnp.exp(score - m_new)                   # [tq, tk] f32
        l_ref[...] = alpha * l_ref[...] + jnp.sum(p, axis=1, keepdims=True)
        # bf16 p / V into the MXU, f32 accumulation: ~2-3x PV matmul rate.
        acc_ref[...] = alpha * acc_ref[...] + jnp.dot(
            p.astype(jnp.bfloat16), k.astype(jnp.bfloat16),
            preferred_element_type=jnp.float32)
        m_ref[...] = m_new

        @pl.when(j == last_j)
        def _finalize():
            inv_l = pl.reciprocal(l_ref[...], approx=False)  # exact, 1x/tile
            o_ref[...] = (acc_ref[...] * inv_l).astype(o_ref.dtype)

    elif softmax_strategy == "simple":
        # Raw scores as attention weights.  Kept in f32: unnormalized scores
        # have large dynamic range, bf16 here would add visible abs. error.
        acc_ref[...] += jnp.dot(score, k32, preferred_element_type=jnp.float32)

        if not acc_in_out:
            @pl.when(j == last_j)
            def _finalize_simple():
                o_ref[...] = acc_ref[...].astype(o_ref.dtype)
    else:
        raise NotImplementedError(softmax_strategy)


def _choose_tiles(Q, T, D, in_bytes, out_bytes, tq, tk):
    # tq: MXU-friendly; >= 2 q-blocks for large Q so both v7x TCs get work.
    if tq is None:
        if Q >= 512:
            tq = 256
        elif Q >= 256:
            tq = 128
        else:
            tq = _round_up(Q, 8)
    else:
        tq = _round_up(tq, 8)
    # tk: large to amortize per-step fixed costs (grid overhead, alpha*acc
    # rescale, DMA setup); for T <= 1024 the whole traj is a single resident
    # block (no re-streaming per q-tile -- the v5e HBM roofline case).
    if tk is None:
        tk = min(1024, _round_up(T, 8))
    else:
        tk = _round_up(tk, 8)

    # VMEM-aware cap (v7x: 64 MiB physical / 32 MiB default scoped).
    budget = 20 * 1024 * 1024

    def est(tq_, tk_):
        return (2 * (tq_ + tk_) * D * in_bytes      # double-buffered q/k tiles
                + 2 * tq_ * D * out_bytes           # output block
                + 2 * tq_ * D * 4 + 2 * tq_ * 4     # qs/acc scratch + m/l
                + 3 * tq_ * tk_ * 4)                # score/p working set

    while est(tq, tk) > budget and tk > 128:
        tk = max(128, _round_up(tk // 2, 8))
    while est(tq, tk) > budget and tq > 128:
        tq = max(128, _round_up(tq // 2, 8))
    return tq, tk


def elastic_attention_block(querry_emb, traj_emb, *, attn_strategy="cos",
                            softmax_strategy="norm", tq=None, tk=None):
    """ElasticAttentionBlock forward.

    attn_strategy: 'cos' | 'dot'.
    softmax_strategy: 'norm' (softmax) or 'simple' (raw scores as attention;
        the PyTorch source leaves this path undefined).  'complex'
        (complexSparsemax) is not available in the source module.
    """
    Q, D = querry_emb.shape
    T, Dk = traj_emb.shape
    if D != Dk:
        raise ValueError("embedding dims must match")
    if attn_strategy not in ("cos", "dot"):
        raise ValueError(f"unknown attn_strategy {attn_strategy!r}")
    if softmax_strategy == "complex":
        # TODO(synk): complexSparsemax is not defined in the provided module.
        raise NotImplementedError("complexSparsemax not available")
    if softmax_strategy not in ("norm", "simple"):
        raise ValueError(f"unknown softmax_strategy {softmax_strategy!r}")

    out_dtype = querry_emb.dtype
    in_bytes = jnp.dtype(querry_emb.dtype).itemsize
    out_bytes = jnp.dtype(out_dtype).itemsize
    tq, tk = _choose_tiles(Q, T, D, in_bytes, out_bytes, tq, tk)

    # Pad ragged Q / T up to tile multiples: tail columns are masked inside
    # the kernel, tail rows are sliced off below.
    Qp = _round_up(Q, tq)
    Tp = _round_up(T, tk)
    q_in = querry_emb if Qp == Q else jnp.pad(querry_emb, ((0, Qp - Q), (0, 0)))
    t_in = traj_emb if Tp == T else jnp.pad(traj_emb, ((0, Tp - T), (0, 0)))

    # f32 output: accumulate directly into o_ref, drop the acc scratch.
    acc_in_out = jnp.dtype(out_dtype) == jnp.dtype(jnp.float32)

    kernel = functools.partial(
        _elastic_attn_kernel,
        attn_strategy=attn_strategy,
        softmax_strategy=softmax_strategy,
        t_actual=T, tk=tk, t_has_pad=(Tp != T),
        acc_in_out=acc_in_out)

    scratch_shapes = [
        pltpu.VMEM((tq, 1), jnp.float32),    # running max m
        pltpu.VMEM((tq, 1), jnp.float32),    # running denom l
        pltpu.VMEM((tq, D), jnp.float32),    # cached (normalized) q tile
    ]
    if not acc_in_out:
        scratch_shapes.append(pltpu.VMEM((tq, D), jnp.float32))  # context acc

    grid = (Qp // tq, Tp // tk)

    out = pl.pallas_call(
        kernel,
        out_shape=jax.ShapeDtypeStruct((Qp, D), out_dtype),
        grid_spec=pltpu.PrefetchScalarGridSpec(
            num_scalar_prefetch=0,
            grid=grid,
            in_specs=[
                pl.BlockSpec((tq, D), lambda i, j: (i, 0)),
                # traj_emb: one input reused as both K and V; block index
                # walks the T axis (first block dim).
                pl.BlockSpec((tk, D), lambda i, j: (j, 0)),
            ],
            out_specs=pl.BlockSpec((tq, D), lambda i, j: (i, 0)),
            scratch_shapes=scratch_shapes,
        ),
        compiler_params=pltpu.CompilerParams(
            dimension_semantics=("parallel", "arbitrary"),
            vmem_limit_bytes=32 * 1024 * 1024),
    )(q_in, t_in)

    return out if Qp == Q else out[:Q]


def _reference(querry_emb, traj_emb, attn_strategy, softmax_strategy):
    q = querry_emb.astype(jnp.float32)
    k = traj_emb.astype(jnp.float32)
    score = q @ k.T
    if attn_strategy == "cos":
        qn = jnp.sqrt(jnp.sum(q * q, axis=1))[:, None]
        kn = jnp.sqrt(jnp.sum(k * k, axis=1))[None, :]
        score = score / (qn * kn)
    if softmax_strategy == "norm":
        atten = jax.nn.softmax(score, axis=1)
    else:
        atten = score
    return atten @ k


if __name__ == "__main__":
    ok = True
    root = jax.random.PRNGKey(0)

    cases = [
        # (Q,  T,  D,   tq,   tk,   attn,  smax)
        (8,   16,  32,  None, None, "cos", "norm"),   # single tile, small D
        (8,   16,  32,  None, None, "dot", "norm"),
        (16,  32,  128, 8,    16,   "cos", "norm"),   # multi-tile grid
        (20,  40,  128, 8,    16,   "cos", "norm"),   # padded/masked Q,T tails
        (20,  40,  128, 8,    16,   "dot", "norm"),
        (16,  32,  128, 8,    16,   "dot", "simple"),
    ]

    for idx, (Q, T, D, tq, tk, attn, smax) in enumerate(cases):
        kq, kt = jax.random.split(jax.random.fold_in(root, idx))
        q = jax.random.normal(kq, (Q, D), dtype=jnp.float32)
        t = jax.random.normal(kt, (T, D), dtype=jnp.float32)
        out = jax.block_until_ready(
            elastic_attention_block(q, t, attn_strategy=attn,
                                    softmax_strategy=smax, tq=tq, tk=tk))
        ref = _reference(q, t, attn, smax)
        # bf16 PV matmul (f32 accumulation) -> slightly loosened tolerance.
        good = bool(jnp.allclose(out, ref, atol=3e-2, rtol=3e-2))
        ok &= good

    if ok:
        print("KERNEL_OK")
</pallas_src>

<mosaic_0001>
module attributes {stable_mosaic.version = 11 : i64} {
  func.func @_elastic_attn_kernel(%arg0: i32, %arg1: i32, %arg2: memref<8x32xf32, #tpu.memory_space<vmem>>, %arg3: memref<16x32xf32, #tpu.memory_space<vmem>>, %arg4: memref<8x32xf32, #tpu.memory_space<vmem>>, %arg5: memref<8x1xf32, #tpu.memory_space<vmem>>, %arg6: memref<8x1xf32, #tpu.memory_space<vmem>>, %arg7: memref<8x32xf32, #tpu.memory_space<vmem>>) attributes {dimension_semantics = [#tpu.dimension_semantics<parallel>, #tpu.dimension_semantics<arbitrary>], iteration_bounds = array<i64: 1, 1>, scalar_prefetch = 0 : i64, scratch_operands = 3 : i64, tpu.core_type = #tpu.core_type<tc>, window_params = [{transform_indices = @transform_0, window_bounds = array<i64: 8, 32>}, {transform_indices = @transform_1, window_bounds = array<i64: 16, 32>}, {transform_indices = @transform_2, window_bounds = array<i64: 8, 32>}]} {
    %c0_i32 = arith.constant 0 : i32
    %0 = arith.cmpi eq, %arg1, %c0_i32 : i32
    %1 = arith.extui %0 : i1 to i32
    %c0_i32_0 = arith.constant 0 : i32
    %2 = arith.cmpi ne, %1, %c0_i32_0 : i32
    scf.if %2 {
      %c0_22 = arith.constant 0 : index
      %c0_23 = arith.constant 0 : index
      %39 = vector.load %arg2[%c0_22, %c0_23] : memref<8x32xf32, #tpu.memory_space<vmem>>, vector<8x32xf32>
      %40 = arith.mulf %39, %39 : vector<8x32xf32>
      %cst_24 = arith.constant dense<0.000000e+00> : vector<8xf32>
      %41 = vector.multi_reduction <add>, %40, %cst_24 [1] : vector<8x32xf32> to vector<8xf32>
      %42 = vector.shape_cast %41 : vector<8xf32> to vector<8x1xf32>
      %43 = math.rsqrt %42 : vector<8x1xf32>
      %44 = vector.broadcast %43 : vector<8x1xf32> to vector<8x32xf32>
      %45 = arith.mulf %39, %44 : vector<8x32xf32>
      %c0_25 = arith.constant 0 : index
      %c0_26 = arith.constant 0 : index
      %46 = vector.load %arg7[%c0_25, %c0_26] : memref<8x32xf32, #tpu.memory_space<vmem>>, vector<8x32xf32>
      tpu.vector_store %arg7[%c0_25, %c0_26], %45 {strides = array<i32>} : memref<8x32xf32, #tpu.memory_space<vmem>>, vector<8x32xf32>,
      %cst_27 = arith.constant 0.000000e+00 : f32
      %47 = vector.broadcast %cst_27 : f32 to vector<8x32xf32>
      %c0_28 = arith.constant 0 : index
      %c0_29 = arith.constant 0 : index
      %48 = vector.load %arg4[%c0_28, %c0_29] : memref<8x32xf32, #tpu.memory_space<vmem>>, vector<8x32xf32>
      tpu.vector_store %arg4[%c0_28, %c0_29], %47 {strides = array<i32>} : memref<8x32xf32, #tpu.memory_space<vmem>>, vector<8x32xf32>,
      %cst_30 = arith.constant 0xFF800000 : f32
      %49 = vector.broadcast %cst_30 : f32 to vector<8x1xf32>
      %c0_31 = arith.constant 0 : index
      %c0_32 = arith.constant 0 : index
      %50 = vector.load %arg5[%c0_31, %c0_32] : memref<8x1xf32, #tpu.memory_space<vmem>>, vector<8x1xf32>
      tpu.vector_store %arg5[%c0_31, %c0_32], %49 {strides = array<i32>} : memref<8x1xf32, #tpu.memory_space<vmem>>, vector<8x1xf32>,
      %cst_33 = arith.constant 0.000000e+00 : f32
      %51 = vector.broadcast %cst_33 : f32 to vector<8x1xf32>
      %c0_34 = arith.constant 0 : index
      %c0_35 = arith.constant 0 : index
      %52 = vector.load %arg6[%c0_34, %c0_35] : memref<8x1xf32, #tpu.memory_space<vmem>>, vector<8x1xf32>
      tpu.vector_store %arg6[%c0_34, %c0_35], %51 {strides = array<i32>} : memref<8x1xf32, #tpu.memory_space<vmem>>, vector<8x1xf32>,
    } else {
    }
    %c0 = arith.constant 0 : index
    %c0_1 = arith.constant 0 : index
    %3 = vector.load %arg7[%c0, %c0_1] : memref<8x32xf32, #tpu.memory_space<vmem>>, vector<8x32xf32>
    %c0_2 = arith.constant 0 : index
    %c0_3 = arith.constant 0 : index
    %4 = vector.load %arg3[%c0_2, %c0_3] : memref<16x32xf32, #tpu.memory_space<vmem>>, vector<16x32xf32>
    %5 = arith.mulf %4, %4 : vector<16x32xf32>
    %cst = arith.constant dense<0.000000e+00> : vector<16xf32>
    %6 = vector.multi_reduction <add>, %5, %cst [1] : vector<16x32xf32> to vector<16xf32>
    %7 = vector.shape_cast %6 : vector<16xf32> to vector<16x1xf32>
    %8 = math.rsqrt %7 : vector<16x1xf32>
    %9 = vector.broadcast %8 : vector<16x1xf32> to vector<16x32xf32>
    %10 = arith.mulf %4, %9 : vector<16x32xf32>
    %cst_4 = arith.constant dense<0.000000e+00> : vector<8x16xf32>
    %11 = tpu.matmul %3, %10, %cst_4 {dimension_numbers = #tpu.dot_dimension_numbers<[1], [1], [0], [0], [0, 0, 1, 0], [], []>} : vector<8x32xf32>, vector<16x32xf32>, vector<8x16xf32> -> vector<8x16xf32>
    %c0_5 = arith.constant 0 : index
    %c0_6 = arith.constant 0 : index
    %12 = vector.load %arg5[%c0_5, %c0_6] : memref<8x1xf32, #tpu.memory_space<vmem>>, vector<8x1xf32>
    %cst_7 = arith.constant dense<0xFF800000> : vector<8xf32>
    %13 = vector.multi_reduction <maximumf>, %11, %cst_7 [1] : vector<8x16xf32> to vector<8xf32>
    %14 = vector.shape_cast %13 : vector<8xf32> to vector<8x1xf32>
    %15 = arith.maximumf %12, %14 : vector<8x1xf32>
    %16 = arith.subf %12, %15 : vector<8x1xf32>
    %17 = math.exp %16 : vector<8x1xf32>
    %18 = vector.broadcast %15 : vector<8x1xf32> to vector<8x16xf32>
    %19 = arith.subf %11, %18 : vector<8x16xf32>
    %20 = math.exp %19 : vector<8x16xf32>
    %c0_8 = arith.constant 0 : index
    %c0_9 = arith.constant 0 : index
    %21 = vector.load %arg6[%c0_8, %c0_9] : memref<8x1xf32, #tpu.memory_space<vmem>>, vector<8x1xf32>
    %22 = arith.mulf %17, %21 : vector<8x1xf32>
    %cst_10 = arith.constant dense<0.000000e+00> : vector<8xf32>
    %23 = vector.multi_reduction <add>, %20, %cst_10 [1] : vector<8x16xf32> to vector<8xf32>
    %24 = vector.shape_cast %23 : vector<8xf32> to vector<8x1xf32>
    %25 = arith.addf %22, %24 : vector<8x1xf32>
    %c0_11 = arith.constant 0 : index
    %c0_12 = arith.constant 0 : index
    %26 = vector.load %arg6[%c0_11, %c0_12] : memref<8x1xf32, #tpu.memory_space<vmem>>, vector<8x1xf32>
    tpu.vector_store %arg6[%c0_11, %c0_12], %25 {strides = array<i32>} : memref<8x1xf32, #tpu.memory_space<vmem>>, vector<8x1xf32>,
    %c0_13 = arith.constant 0 : index
    %c0_14 = arith.constant 0 : index
    %27 = vector.load %arg4[%c0_13, %c0_14] : memref<8x32xf32, #tpu.memory_space<vmem>>, vector<8x32xf32>
    %28 = vector.broadcast %17 : vector<8x1xf32> to vector<8x32xf32>
    %29 = arith.mulf %28, %27 : vector<8x32xf32>
    %30 = arith.truncf %20 : vector<8x16xf32> to vector<8x16xbf16>
    %31 = arith.truncf %4 : vector<16x32xf32> to vector<16x32xbf16>
    %cst_15 = arith.constant dense<0.000000e+00> : vector<8x32xf32>
    %32 = tpu.matmul %30, %31, %cst_15 {dimension_numbers = #tpu.dot_dimension_numbers<[1], [0], [0], [1], [0, 0, 1, 1], [], []>} : vector<8x16xbf16>, vector<16x32xbf16>, vector<8x32xf32> -> vector<8x32xf32>
    %33 = arith.addf %29, %32 : vector<8x32xf32>
    %c0_16 = arith.constant 0 : index
    %c0_17 = arith.constant 0 : index
    %34 = vector.load %arg4[%c0_16, %c0_17] : memref<8x32xf32, #tpu.memory_space<vmem>>, vector<8x32xf32>
    tpu.vector_store %arg4[%c0_16, %c0_17], %33 {strides = array<i32>} : memref<8x32xf32, #tpu.memory_space<vmem>>, vector<8x32xf32>,
    %c0_18 = arith.constant 0 : index
    %c0_19 = arith.constant 0 : index
    %35 = vector.load %arg5[%c0_18, %c0_19] : memref<8x1xf32, #tpu.memory_space<vmem>>, vector<8x1xf32>
    tpu.vector_store %arg5[%c0_18, %c0_19], %15 {strides = array<i32>} : memref<8x1xf32, #tpu.memory_space<vmem>>, vector<8x1xf32>,
    %c0_i32_20 = arith.constant 0 : i32
    %36 = arith.cmpi eq, %arg1, %c0_i32_20 : i32
    %37 = arith.extui %36 : i1 to i32
    %c0_i32_21 = arith.constant 0 : i32
    %38 = arith.cmpi ne, %37, %c0_i32_21 : i32
    scf.if %38 {
      %c0_22 = arith.constant 0 : index
      %c0_23 = arith.constant 0 : index
      %39 = vector.load %arg6[%c0_22, %c0_23] : memref<8x1xf32, #tpu.memory_space<vmem>>, vector<8x1xf32>
      %40 = tpu.reciprocal %39 : vector<8x1xf32> -> vector<8x1xf32>
      %c0_24 = arith.constant 0 : index
      %c0_25 = arith.constant 0 : index
      %41 = vector.load %arg4[%c0_24, %c0_25] : memref<8x32xf32, #tpu.memory_space<vmem>>, vector<8x32xf32>
      %42 = vector.broadcast %40 : vector<8x1xf32> to vector<8x32xf32>
      %43 = arith.mulf %41, %42 : vector<8x32xf32>
      %c0_26 = arith.constant 0 : index
      %c0_27 = arith.constant 0 : index
      %44 = vector.load %arg4[%c0_26, %c0_27] : memref<8x32xf32, #tpu.memory_space<vmem>>, vector<8x32xf32>
      tpu.vector_store %arg4[%c0_26, %c0_27], %43 {strides = array<i32>} : memref<8x32xf32, #tpu.memory_space<vmem>>, vector<8x32xf32>,
    } else {
    }
    return
  }
  func.func @transform_0(%arg0: i32, %arg1: i32) -> (i32, i32) {
    %c0_i32 = arith.constant 0 : i32
    %c0_i32_0 = arith.constant 0 : i32
    return %arg0, %c0_i32 : i32, i32
  }
  func.func @transform_1(%arg0: i32, %arg1: i32) -> (i32, i32) {
    %c0_i32 = arith.constant 0 : i32
    %c0_i32_0 = arith.constant 0 : i32
    return %arg1, %c0_i32 : i32, i32
  }
  func.func @transform_2(%arg0: i32, %arg1: i32) -> (i32, i32) {
    %c0_i32 = arith.constant 0 : i32
    %c0_i32_0 = arith.constant 0 : i32
    return %arg0, %c0_i32 : i32, i32
  }
}

</mosaic_0001>

<bundles_post_ra>
// kernel: tpu_custom_call.1
= control target key start
LH: loop header
LB: loop body
LE: loop exit
PB: predicated region body
PF: predicated region fallthrough
CT: control target
= control target key end

     0   :  { %7 = vsyncpa [#allocation6], 0  ;;  %s421_s0 = inlined_call_operand.hbm [shape: f32[8,32], index: 0, kind: input, shape index: {}]   ;;  %s422_s1 = inlined_call_operand.hbm [shape: f32[16,32], index: 1, kind: input, shape index: {}]   ;;  %s423_s2 = inlined_call_operand.hbm [shape: f32[8,32], index: 2, kind: output, shape index: {}]  }
   0x1   :  { %8 = vsyncpa [#allocation9], 0 }
   0x2   :  { %9 = vsyncpa [#allocation7], 0  ;;  %s371_s9 = smov [#allocation5]   ;;  %s372_s11 = smov [#allocation8]  }
   0x3   :  { %s16_s10 = sshll.u32 %s371_s9, 4  ;;  %s25_s12 = sshll.u32 %s372_s11, 4  ;;  %s17_s10 = int_to_ptr.vmem [resolvable:$true] %s16_s10  ;;  %s26_s12 = int_to_ptr.vmem [resolvable:$true] %s25_s12 }
   0x4   :  { %s313_s13 = scalar_lea.vmem %s17_s10, 128  ;;  %p318_p1 = scmp.lt.s32.totalorder %s17_s10, %s17_s10 }
   0x5   :  { %p314_p0 = scmp.ne.s32.totalorder %s17_s10, %s313_s13  ;;  %p319_p2 = scmp.lt.s32.totalorder %s313_s13, %s313_s13 }
   0x7   :  { %p320_p3 = por %p319_p2, %p318_p1 }
   0x9   :  { %p321_p4 = pnand %p320_p3, %p314_p0 }
   0xb   :  { %324 = shalt.err (!%p321_p4)
}
   0xc   :  { %19 = dma.hbm_to_vmem [thread:$0]  %s421_s0, 128, %s17_s10, [#allocation6]  }
   0xd   :  { %s333_s16 = scalar_lea.vmem %s26_s12, 256  ;;  %p338_p6 = scmp.lt.s32.totalorder %s26_s12, %s26_s12 }
   0xe   :  { %p334_p5 = scmp.ne.s32.totalorder %s26_s12, %s333_s16  ;;  %p339_p7 = scmp.lt.s32.totalorder %s333_s16, %s333_s16 }
  0x10   :  { %p340_p8 = por %p339_p7, %p338_p6 }
  0x12   :  { %p341_p9 = pnand %p340_p8, %p334_p5 }
  0x14   :  { %344 = shalt.err (!%p341_p9)
}
  0x15   :  { %s373_s17 = smov 128   ;;  %s374_s18 = smov 8  }
  0x16   :  { %31 = dma.hbm_to_vmem [thread:$0]  %s422_s1, 256, %s26_s12, [#allocation9], %s373_s17, %s373_s17, %s374_s18  }
  0x17   :  { %365 = dma.done.wait [#allocation6], 128  }
  0x18   :  { %366 = vsyncadd [#allocation6], 4294967168 }
  0x19   :  { %367 = dma.done.wait [#allocation9], 256  }
  0x1a   :  { %368 = vsyncadd [#allocation9], 4294967040  ;;  %v43_v0 = vld [vmem:[#allocation5] sm:$0xff]  ;;  %vm45_vm0 = vcmask 261120   ;;  %v58_v1 = vld [vmem:[#allocation8 + $0x8] sm:$0xff]  ;;  %v375_v9 = vmov 0.0  }
  0x1b   :  { %v57_v2 = vld [vmem:[#allocation8] sm:$0xff]  ;;  %v44_v3 = vmul.f32 %v43_v0, %v43_v0  ;;  %v60_v4 = vmul.f32 %v58_v1, %v58_v1  ;;  %52 = vst.msk [vmem:[#allocation10] sm:$0xff] %vm45_vm0, %v375_v9  ;;  %269 = vmatprep.subr.mxu0 %v375_v9  ;;  %276 = vmatprep.subr.bf16.mxu1 %v375_v9  ;;  %vm376_vm1 = vmmov 0   ;;  %vm53_vm2 = vcmask 7168   ;;  %s379_s0 = smov [#allocation10]  }
  0x1c   :  { %v59_v5 = vmul.f32 %v57_v2, %v57_v2  ;;  %273 = vmatprep.mubr.msk.f32.mxu0 %vm376_vm1, %v375_v9  ;;  %278 = vmatprep.mubr.msk.bf16.mxu1 %vm376_vm1, %v375_v9  ;;  %v377_v20 = vmov -inf   ;;  %55 = vst.msk [vmem:[#allocation3] sm:$0xff] %vm53_vm2, %v375_v9  ;;  %vm152_vm3 = vcmask 130048   ;;  %v378_v24 = vmov 0   ;;  %s250_s1 = sshll.u32 %s379_s0, 4  ;;  %s251_s1 = int_to_ptr.vmem [resolvable:$true] %s250_s1 }
  0x1d   :  { %v46_v6 = vsel %vm45_vm0, %v44_v3, 0.0  ;;  %v65_v8 = vsel %vm45_vm0, %v60_v4, 0.0  ;;  %54 = vst.msk [vmem:[#allocation2] sm:$0xff] %vm53_vm2, %v377_v20  ;;  %291 = vset.pattern.permute.xlu0 %v378_v24  ;;  %292 = vset.pattern.permute.xlu1 %v378_v24  ;;  %v184_v29 = vpack.c.bf16 %v58_v1, %v57_v2  ;;  %s345_s21 = scalar_lea.vmem %s251_s1, 128  ;;  %p350_p11 = scmp.lt.s32.totalorder %s251_s1, %s251_s1 }
  0x1e   :  { %v62_v7 = vsel %vm45_vm0, %v59_v5, 0.0  ;;  %47 = vadd.xlane.f32.xlu0 %v46_v6  ;;  %p346_p10 = scmp.ne.s32.totalorder %s251_s1, %s345_s21  ;;  %p351_p12 = scmp.lt.s32.totalorder %s345_s21, %s345_s21 }
  0x1f   :  { %63 = vadd.xlane.f32.xlu1 %v62_v7  ;;  %277 = vmatpush3.bf16.msra.mxu1 %v184_v29 }
  0x20   :  { %p352_p13 = por %p351_p12, %p350_p11 }
  0x22   :  { %66 = vadd.xlane.f32.xlu0 %v65_v8  ;;  %v176_v44 = vld [vmem:[#allocation10] sm:$0xff]  ;;  %p353_p0 = pnand %p352_p13, %p346_p10 }
  0x23   :  { %v168_v38 = vld [vmem:[#allocation3] sm:$0xff] }
  0x24   :  { %v151_v25 = vld [vmem:[#allocation2] sm:$0xff] }
  0xa7   :  { %v48_v10 = vpop.xlane.xlu0 %47 }
  0xa8   :  { %293 = vrsqrt.f32 %v48_v10  ;;  %v64_v11 = vpop.xlane.xlu1 %63 }
  0xa9   :  { %295 = vrsqrt.f32 %v64_v11 }
  0xab   :  { %v67_v12 = vpop.xlane.xlu0 %66 }
  0xac   :  { %297 = vrsqrt.f32 %v67_v12 }
  0xb5   :  { %v294_v13 = vpop.eup %293 }
  0xb6   :  { %v50_v14 = vmul.f32 %v294_v13, %v43_v0  ;;  %v296_v15 = vpop.eup %295 }
  0xb7   :  { %v70_v18 = vmul.f32 %v296_v15, %v57_v2 }
  0xb8   :  { %51 = vst.msk [vmem:[#allocation4] sm:$0xff] %vm45_vm0, %v50_v14 }
  0xb9   :  { %v298_v16 = vpop.eup %297 }
  0xba   :  { %v71_v17 = vmul.f32 %v298_v16, %v58_v1 }
  0xbc   :  { %270 = vmatpush3.xpose.msk.msra.mxu0 %vm45_vm0, %v71_v17 }
  0xbd   :  { %271 = vmatprep.subr.mxu0 %v375_v9 }
  0xbf   :  { %v56_v19 = vld [vmem:[#allocation4] sm:$0xff] }
  0xc0   :  { %272 = vmatpush3.xpose.msk.msra.mxu0 %vm45_vm0, %v70_v18 }
  0xc3   :  { %274 = vmatmul.mubr.msk.f32.vlgmr.msra.gmra.mxu0 %vm45_vm0, %v56_v19 }
 0x183   :  { %v147_v21 = vpop.f32.mrf.mxu0 }
 0x184   :  { %v153_v22 = vsel %vm152_vm3, %v147_v21, -inf }
 0x185   :  { %154 = vmax.xlane.f32.xlu1 %v153_v22  ;;  %v275_v23 = vpop.f32.mrf.mxu0 }
 0x20e   :  { %v155_v26 = vpop.xlane.xlu1 %154 }
 0x20f   :  { %v156_v27 = vmax.f32 %v151_v25, %v155_v26 }
 0x211   :  { %v157_v28 = vsub.f32 %v151_v25, %v156_v27  ;;  %230 = vst.msk [vmem:[#allocation2] sm:$0xff] %vm53_vm2, %v156_v27  ;;  %162 = vperm.xlu0 %291, %v156_v27  }
 0x213   :  { %v158_v34 = vmul.f32 1.442695, %v157_v28 }
 0x28c   :  { %v163_v30 = vpop.permute.xlu0 %162 }
 0x28d   :  { %v165_v31 = vsub.f32 %v147_v21, %v163_v30 }
 0x28f   :  { %v166_v32 = vmul.f32 1.442695, %v165_v31 }
 0x291   :  { %299 = vpow2.f32 %v166_v32 }
 0x292   :  { %301 = vpow2.f32 %v158_v34 }
 0x29e   :  { %v300_v33 = vpop.eup %299 }
 0x29f   :  { %v170_v35 = vsel %vm152_vm3, %v300_v33, 0.0  ;;  %v183_v36 = vpack.c.bf16 %v300_v33, %v300_v33  ;;  %v302_v37 = vpop.eup %301 }
 0x2a0   :  { %171 = vadd.xlane.f32.xlu1 %v170_v35  ;;  %v169_v39 = vmul.f32 %v302_v37, %v168_v38 }
 0x2a1   :  { %279 = vmatmul.mubr.msk.bf16.vlgmr.msra.gmra.mxu1 %vm152_vm3, %v183_v36 }
 0x2b1   :  { %179 = vperm.xlu1 %292, %v302_v37  }
 0x329   :  { %v172_v40 = vpop.xlane.xlu1 %171 }
 0x32a   :  { %v173_v41 = vadd.f32 %v172_v40, %v169_v39 }
 0x32c   :  { %175 = vst.msk [vmem:[#allocation3] sm:$0xff] %vm53_vm2, %v173_v41 }
 0x32d   :  { %v180_v45 = vpop.permute.xlu1 %179 }
 0x32e   :  { %v182_v46 = vmul.f32 %v180_v45, %v176_v44 }
 0x333   :  { %v234_v42 = vld [vmem:[#allocation3] sm:$0xff] }
 0x334   :  { %303 = vrcp.f32 %v234_v42 }
 0x341   :  { %v304_v43 = vpop.eup %303 }
 0x342   :  { %239 = vperm.xlu1 %292, %v304_v43  }
 0x361   :  { %v222_v47 = vpop.f32.mrf.mxu1 }
 0x362   :  { %v228_v48 = vadd.f32 %v222_v47, %v182_v46 }
 0x363   :  { %v280_v49 = vpop.f32.mrf.mxu1 }
 0x364   :  { %229 = vst.msk [vmem:[#allocation10] sm:$0xff] %vm45_vm0, %v228_v48 }
 0x365   :  { %v225_v50 = vpop.f32.mrf.mxu1 }
 0x367   :  { %v281_v51 = vpop.f32.mrf.mxu1 }
 0x36b   :  { %v236_v52 = vld [vmem:[#allocation10] sm:$0xff] }
 0x3bd   :  { %v240_v53 = vpop.permute.xlu1 %239 }
 0x3be   :  { %v242_v54 = vmul.f32 %v240_v53, %v236_v52 }
 0x3c0   :  { %243 = vst.msk [vmem:[#allocation10] sm:$0xff] %vm45_vm0, %v242_v54 }
 0x3c1   :  { %356 = shalt.err (!%p353_p0)
}
 0x3c2   :  { %253 = dma.vmem_to_hbm [thread:$0]  %s251_s1, 128, %s423_s2, [#allocation7]  }
 0x3c3   :  { %369 = dma.done.wait [#allocation7], 128  }
 0x3c4   :  { %370 = vsyncadd [#allocation7], 4294967168 }
 0x3c5   :  { %257 = vsyncpa [#allocation6], 1 }
 0x3c6   :  { %258 = vsyncpa [#allocation9], 1 }
 0x3c7   :  { %259 = vsyncpa [#allocation7], 1 }

</bundles_post_ra>
